<compile_context>
chip_gen: v7x
topology: tpu7x:2x2x1
jax: 0.10.0
libtpu: 0.0.40
codegen_flags: <defaults>
</compile_context>

<pallas_src>
import jax
import jax.numpy as jnp
from jax.experimental import pallas as pl
from jax.experimental.pallas import tpu as pltpu


def _round_up(x, m):
    return ((x + m - 1) // m) * m


def _choose_batch_tile(b, *, max_tb=512, min_tb=8, min_tiles=8, max_pad=64):
    """Pick the largest batch tile (multiple of 8) such that padding waste stays
    bounded and there are enough grid steps for v7x's two TensorCores to split
    the batch axis (no-op on v5e/v6e)."""
    tb = max_tb
    while tb > min_tb:
        b_pad = _round_up(b, tb)
        if (b_pad - b) <= max_pad and (b_pad // tb) >= min_tiles:
            return tb
        tb //= 2
    return min_tb


def _gather_kernel(labels_ref, table_ref, out_ref):
    # labels_ref: (b_pad, 1) int32 — ALL final labels, resident in VMEM
    # table_ref:  (r_pad, H) f32   — full embedding table, resident in VMEM
    # out_ref:    (tb, H)    f32   — output tile for this grid step
    tb = out_ref.shape[0]
    r_pad = table_ref.shape[0]

    start = pl.multiple_of(pl.program_id(0) * tb, 8)
    lbl = labels_ref[pl.ds(start, tb), :]                       # (tb, 1) int32

    col = jax.lax.broadcasted_iota(jnp.int32, (tb, r_pad), 1)   # (tb, r_pad)
    onehot = (col == lbl).astype(table_ref.dtype)               # exact 0/1 f32

    # One-hot x table on the MXU.  HIGHEST precision keeps the f32 gather
    # bit-exact (default precision would truncate table values to bf16).
    out_ref[...] = jnp.dot(
        onehot,
        table_ref[...],
        precision=jax.lax.Precision.HIGHEST,
        preferred_element_type=jnp.float32,
    ).astype(out_ref.dtype)


def _pallas_embedding_gather(final_labels, table):
    """[B] int32 labels, [num_rows, H] table -> [B, H] embeddings."""
    B = final_labels.shape[0]
    num_rows, H = table.shape

    tb = _choose_batch_tile(B)
    b_pad = _round_up(B, tb)
    r_pad = _round_up(num_rows, 8)

    labels_p = final_labels
    if b_pad != B:
        # Padded rows point at row 0; they are sliced off below.
        labels_p = jnp.pad(final_labels, (0, b_pad - B))
    labels_2d = labels_p.reshape(b_pad, 1)

    table_p = table
    if r_pad != num_rows:
        table_p = jnp.pad(table, ((0, r_pad - num_rows), (0, 0)))

    out = pl.pallas_call(
        _gather_kernel,
        out_shape=jax.ShapeDtypeStruct((b_pad, H), table.dtype),
        grid_spec=pltpu.PrefetchScalarGridSpec(
            num_scalar_prefetch=0,
            grid=(b_pad // tb,),
            in_specs=[
                # All labels resident in VMEM (constant block index, no
                # per-step label DMAs); sliced in-kernel with pl.ds.
                pl.BlockSpec((b_pad, 1), lambda i: (0, 0)),
                # Full embedding table resident in VMEM.
                pl.BlockSpec((r_pad, H), lambda i: (0, 0)),
            ],
            out_specs=pl.BlockSpec((tb, H), lambda i: (i, 0)),
        ),
        compiler_params=pltpu.CompilerParams(
            dimension_semantics=("parallel",)),
    )(labels_2d, table_p)

    return out if b_pad == B else out[:B]


def label_embedder_forward(labels, table, num_classes, dropout_prob,
                           drop_uniform=None, *, min_pallas_batch=512,
                           force_pallas=False):
    """Pallas equivalent of LabelEmbedder.forward.

    labels:       [B] integer class ids in [0, num_classes)
    table:        [num_classes + (dropout_prob > 0), H] f32 embedding table
    drop_uniform: [B] uniform(0,1) draws standing in for torch.rand(B) inside
                  token_dropper (required iff dropout_prob > 0)
    returns:      [B, H] f32 embeddings
    """
    final_labels = labels.astype(jnp.int32)
    if dropout_prob > 0:
        assert drop_uniform is not None, "dropout_prob > 0 needs drop_uniform"
        # token_dropper: torch.rand(B) < dropout_prob -> replace with null id.
        final_labels = jnp.where(drop_uniform < dropout_prob,
                                 jnp.int32(num_classes), final_labels)

    B = final_labels.shape[0]
    if B < min_pallas_batch and not force_pallas:
        # Tiny gather: kernel launch + pipeline prologue dwarfs the work;
        # native XLA gather is faster and bit-exact.
        return table[final_labels]
    return _pallas_embedding_gather(final_labels, table)


if __name__ == "__main__":
    NUM_CLASSES = 16
    HIDDEN = 128
    DROPOUT_PROB = 0.1
    B = 64

    key = jax.random.PRNGKey(0)
    k_table, k_labels, k_drop = jax.random.split(key, 3)

    use_cfg_embedding = int(DROPOUT_PROB > 0)
    # nn.Embedding(num_classes + use_cfg_embedding, hidden_size) weights.
    table = (jax.random.normal(
        k_table, (NUM_CLASSES + use_cfg_embedding, HIDDEN), jnp.float32) * 0.02)

    labels = jax.random.randint(k_labels, (B,), 0, NUM_CLASSES, dtype=jnp.int32)
    # token_dropper randomness: torch.rand(B)
    drop_uniform = jax.random.uniform(k_drop, (B,))

    # force_pallas=True so the demo exercises the kernel even at this small B
    # (the default policy would route B=64 to the XLA fast path).
    out = label_embedder_forward(labels, table, NUM_CLASSES, DROPOUT_PROB,
                                 drop_uniform, force_pallas=True)
    out = jax.block_until_ready(out)

    # Pure-JAX reference of the exact semantics.
    final_labels = jnp.where(drop_uniform < DROPOUT_PROB, NUM_CLASSES, labels)
    ref = table[final_labels]

    assert out.shape == (B, HIDDEN)
    assert out.dtype == jnp.float32
    assert jnp.allclose(out, ref, rtol=1e-6, atol=1e-8), \
        "mismatch vs reference embedding lookup"

    print("KERNEL_OK")
</pallas_src>

<mosaic_0001>
module attributes {stable_mosaic.version = 11 : i64} {
  func.func @_gather_kernel(%arg0: i32, %arg1: memref<64x1xi32, #tpu.memory_space<vmem>>, %arg2: memref<24x128xf32, #tpu.memory_space<vmem>>, %arg3: memref<8x128xf32, #tpu.memory_space<vmem>>) attributes {dimension_semantics = [#tpu.dimension_semantics<parallel>], iteration_bounds = array<i64: 8>, scalar_prefetch = 0 : i64, scratch_operands = 0 : i64, tpu.core_type = #tpu.core_type<tc>, window_params = [{pipeline_mode = #tpu.pipeline_mode<synchronous>, transform_indices = @transform_0, window_bounds = array<i64: 64, 1>}, {pipeline_mode = #tpu.pipeline_mode<synchronous>, transform_indices = @transform_1, window_bounds = array<i64: 24, 128>}, {transform_indices = @transform_2, window_bounds = array<i64: 8, 128>}]} {
    %c8_i32 = arith.constant 8 : i32
    %0 = arith.muli %arg0, %c8_i32 : i32
    %1 = tpu.assume_multiple %0, 8 : i32
    %2 = arith.index_cast %1 : i32 to index
    %c0 = arith.constant 0 : index
    %3 = vector.load %arg1[%2, %c0] : memref<64x1xi32, #tpu.memory_space<vmem>>, vector<8x1xi32>
    %4 = tpu.iota {dimensions = array<i32: 1>} : vector<8x24xi32>
    %5 = vector.broadcast %3 : vector<8x1xi32> to vector<8x24xi32>
    %6 = arith.cmpi eq, %4, %5 : vector<8x24xi32>
    %7 = arith.extui %6 : vector<8x24xi1> to vector<8x24xi32>
    %8 = arith.sitofp %7 : vector<8x24xi32> to vector<8x24xf32>
    %c0_0 = arith.constant 0 : index
    %c0_1 = arith.constant 0 : index
    %9 = vector.load %arg2[%c0_0, %c0_1] : memref<24x128xf32, #tpu.memory_space<vmem>>, vector<24x128xf32>
    %cst = arith.constant dense<0.000000e+00> : vector<8x128xf32>
    %10 = tpu.matmul %8, %9, %cst {dimension_numbers = #tpu.dot_dimension_numbers<[1], [0], [0], [1], [0, 0, 1, 1], [], []>, precision = #tpu.contract_precision<fp32>} : vector<8x24xf32>, vector<24x128xf32>, vector<8x128xf32> -> vector<8x128xf32>
    %c0_2 = arith.constant 0 : index
    %c0_3 = arith.constant 0 : index
    %11 = vector.load %arg3[%c0_2, %c0_3] : memref<8x128xf32, #tpu.memory_space<vmem>>, vector<8x128xf32>
    tpu.vector_store %arg3[%c0_2, %c0_3], %10 {strides = array<i32>} : memref<8x128xf32, #tpu.memory_space<vmem>>, vector<8x128xf32>,
    return
  }
  func.func @transform_0(%arg0: i32) -> (i32, i32) {
    %c0_i32 = arith.constant 0 : i32
    %c0_i32_0 = arith.constant 0 : i32
    %c0_i32_1 = arith.constant 0 : i32
    return %c0_i32, %c0_i32_0 : i32, i32
  }
  func.func @transform_1(%arg0: i32) -> (i32, i32) {
    %c0_i32 = arith.constant 0 : i32
    %c0_i32_0 = arith.constant 0 : i32
    %c0_i32_1 = arith.constant 0 : i32
    return %c0_i32, %c0_i32_0 : i32, i32
  }
  func.func @transform_2(%arg0: i32) -> (i32, i32) {
    %c0_i32 = arith.constant 0 : i32
    %c0_i32_0 = arith.constant 0 : i32
    return %arg0, %c0_i32 : i32, i32
  }
}

</mosaic_0001>

<bundles_post_ra>
// kernel: tpu_custom_call.1
= control target key start
LH: loop header
LB: loop body
LE: loop exit
PB: predicated region body
PF: predicated region fallthrough
CT: control target
= control target key end

     0   :  { %7 = vsyncpa [#allocation3], 0  ;;  %s1040_s0 = inlined_call_operand.vmem [shape: s32[64,1], index: 0, kind: input, shape index: {}]   ;;  %s1041_s1 = inlined_call_operand.vmem [shape: f32[24,128], index: 1, kind: input, shape index: {}]   ;;  %s1042_s2 = inlined_call_operand.hbm [shape: f32[64,128], index: 2, kind: output, shape index: {}]  }
   0x1   :  { %9 = vsyncpa [#allocation3 + $0x1], 0  ;;  %s922_s9 = smov 0   ;;  %s924_s10 = smov 0  }
   0x2   :  { %s926_s11 = smov 0   ;;  %s928_s12 = smov 0  }
   0x3 LB: > { %s943_s13 = sadd.s32 4294967295, %s900_s12   ;;  %s676_s14 = sadd.s32 4294967294, %s900_s12   ;;  %s900_s12 = sphi %s928_s12, %s1048_s12   ;;  %s896_s11 = sphi %s926_s11, %s1047_s11   ;;  %s892_s10 = sphi %s924_s10, %s1046_s10   ;;  %s888_s9 = sphi %s922_s9, %s1045_s9  }
   0x4   : > { %s947_s15 = sadd.s32 1, %s900_s12   ;;  %s64_s16 = sadd.s32 1, %s896_s11 }
   0x5   : > { %s61_s17 = ssub.s32 %s900_s12, %s947_s15  ;;  %p74_p0 = scmp.ne.s32.totalorder %s896_s11, %s892_s10 }
   0x6   : > { %p62_p1 = scmp.eq.s32.totalorder %s61_s17, 0  ;;  %p75_p2 = scmp.eq.s32.totalorder %s943_s13, 7 }
   0x7   : > { %p80_p3 = scmp.ne.s32.totalorder %s892_s10, %s888_s9  ;;  %p81_p4 = scmp.eq.s32.totalorder %s676_s14, 7 }
   0x8   : > { %s958_s18 = scalar_select %p62_p1, %s896_s11, %s64_s16  }
   0x9   : > { %p960_p5 = por %p75_p2, %p74_p0  ;;  %p964_p6 = por %p81_p4, %p80_p3 }
   0xa   : > { %p678_p7 = scmp.ge.s32.totalorder %s900_s12, 1  ;;  %p105_p8 = scmp.lt.s32.totalorder %s900_s12, 9 }
   0xc   : > { %p106_p9 = pnand %p678_p7, %p105_p8 }
   0xd   : > { %s680_s21 = sshll.u32 (!%p106_p9), %s943_s13, 3  ;;  %v133_v0 = vld [vmem:[%s1041_s1] sm:$0xff] (!%p106_p9)  ;;  %v134_v1 = vld [vmem:[%s1041_s1 + $0x8] sm:$0xff] (!%p106_p9)  ;;  %v902_v2 = vmov (!%p106_p9), 0   ;;  %v903_v7 = vmov (!%p106_p9), 0.0|0.0   ;;  %v904_v10 = vmov (!%p106_p9), 0.0   ;;  %v125_v22 = vlaneseq (!%p106_p9) }
   0xe   : > { %109 = sbr.rel (%p106_p9) target bundleno = 399 (0x18f), region = 28  ;;  %837 = vset.pattern.permute.xlu0 (!%p106_p9), %v902_v2  ;;  %s123_s28 = scalar_lea.vmem (!%p106_p9), %s1040_s0, %s680_s21  ;;  %v141_v3 = vand.u32 (!%p106_p9), 4294901760, %v133_v0  ;;  %v144_v4 = vand.u32 (!%p106_p9), 4294901760, %v134_v1  ;;  %776 = vmatprep.subr.bf16.mxu0 (!%p106_p9), %v903_v7  ;;  %v135_v11 = vld [vmem:[%s1041_s1 + $0x10] sm:$0xff] (!%p106_p9)  ;;  %vm905_vm0 = vmmov (!%p106_p9), 0   ;;  %vm136_vm1 = vcmask (!%p106_p9), 195584  }
   0xf   : > { %v124_v5 = vld [vmem:[%s123_s28] sm:$0xff] (!%p106_p9)  ;;  %767 = vmatprep.subr.bf16.mxu1 (!%p106_p9), %v903_v7  ;;  %v147_v12 = vand.u32 (!%p106_p9), 4294901760, %v135_v11  ;;  %746 = vmatprep.mubr.msk.f32.mxu0 (!%p106_p9), %vm905_vm0, %v904_v10  ;;  %v126_v23 = vand.u32 (!%p106_p9), 127, %v125_v22  ;;  %s119_s3 = sand.u32 (!%p106_p9), 1, %s892_s10   ;;  %s686_s5 = sshll.u32 (!%p106_p9), %s943_s13, 7 }
  0x10   : > { %128 = vperm.xlu0 (!%p106_p9), %837, %v124_v5   ;;  %v768_v6 = vpack.c.bf16 (!%p106_p9), %v144_v4, %v141_v3  ;;  %v220_v8 = vsub.f32 (!%p106_p9), %v133_v0, %v141_v3  ;;  %v227_v9 = vsub.f32 (!%p106_p9), %v134_v1, %v144_v4  ;;  %719 = vmatprep.mubr.msk.f32.mxu1 (!%p106_p9), %vm905_vm0, %v904_v10  ;;  %s679_s4 = sshll.u32 (!%p106_p9), %s119_s3, 3  ;;  %s998_s16 = scalar_lea.hbm (!%p106_p9), %s1042_s2, %s686_s5 }
  0x11   : > { %v234_v25 = vsub.f32 (!%p106_p9), %v135_v11, %v147_v12  ;;  %s121_s6 = scalar_lea.vmem (!%p106_p9), [#allocation2], %s679_s4  ;;  %s614_s17 = scalar_lea.sflag (!%p106_p9), [#allocation3], %s119_s3 }
  0x12   : > { %778 = vmatpush3.bf16.msra.mxu0 (!%p106_p9), %v768_v6  ;;  %769 = vmatpush3.bf16.msra.mxu1 (!%p106_p9), %v768_v6  ;;  %v221_v13 = vand.u32 (!%p106_p9), 4294901760, %v220_v8  ;;  %v228_v14 = vand.u32 (!%p106_p9), 4294901760, %v227_v9  ;;  %v774_v21 = vpack.c.bf16 (!%p106_p9), %v227_v9, %v220_v8  ;;  %s627_s7 = sshll.u32 (!%p106_p9), %s121_s6, 4  ;;  %s906_s13 = smov (!%p106_p9), [#allocation2]   ;;  %s1000_s7 = int_to_ptr.vmem [resolvable:$true] %s627_s7 }
  0x13   : > { %744 = vmatprep.subr.mxu0 (!%p106_p9), %v904_v10  ;;  %717 = vmatprep.subr.mxu1 (!%p106_p9), %v904_v10  ;;  %v235_v29 = vand.u32 (!%p106_p9), 4294901760, %v234_v25  ;;  %s838_s21 = scalar_lea.vmem (!%p106_p9), %s1000_s7, 128  ;;  %s842_s22 = sshll.u32 (!%p106_p9), %s906_s13, 4  ;;  %s843_s22 = int_to_ptr.vmem [resolvable:$false] %s842_s22 }
  0x14   : > { %v780_v15 = vpack.c.bf16 (!%p106_p9), %v228_v14, %v221_v13  ;;  %v222_v16 = vsub.f32 (!%p106_p9), %v220_v8, %v221_v13  ;;  %v229_v17 = vsub.f32 (!%p106_p9), %v227_v9, %v228_v14  ;;  %p839_p10 = scmp.ne.s32.totalorder (!%p106_p9), %s1000_s7, %s838_s21  ;;  %s844_s23 = scalar_lea.vmem (!%p106_p9), %s843_s22, 256 }
  0x15   : > { %v236_v32 = vsub.f32 %v234_v25, %v235_v29  ;;  %p845_p13 = scmp.lt.s32.totalorder %s1000_s7, %s843_s22  ;;  %p846_p0 = scmp.lt.s32.totalorder %s844_s23, %s838_s21 }
  0x16   : > { %745 = vmatpush3.msra.mxu0 %v147_v12  ;;  %718 = vmatpush3.msra.mxu1 %v147_v12  ;;  %v223_v18 = vand.u32 4294901760, %v222_v16  ;;  %v230_v19 = vand.u32 4294901760, %v229_v17  ;;  %p840_p11 = pnand %p839_p10, %p960_p5 }
  0x17   : > { %779 = vmatprep.subr.bf16.mxu0 %v903_v7  ;;  %770 = vmatprep.subr.bf16.mxu1 %v903_v7  ;;  %v237_v34 = vand.u32 4294901760, %v236_v32  ;;  %p847_p1 = por %p846_p0, %p845_p13 }
  0x18   : > { %v771_v20 = vpack.c.bf16 %v230_v19, %v223_v18  ;;  %p841_p12 = pneg %p840_p11 }
  0x1a   : > { %p848_p2 = pnand %p847_p1, %p841_p12 }
  0x8f   : > { %v129_v24 = vpop.permute.xlu0 %128 }
  0x90   : > { %vm130_vm2 = vcmp.eq.s32.totalorder %v126_v23, %v129_v24 }
  0x91   : > { %v681_v26 = vsel %vm130_vm2, 1.0, %v904_v10 }
  0x92   : > { %v138_v27 = vsel %vm136_vm1, %v681_v26, 0 }
  0x93   : > { %v209_v28 = vsub.f32 %v138_v27, %v138_v27 }
  0x95   : > { %v210_v30 = vand.u32 4294901760, %v209_v28 }
  0x97   : > { %747 = vmatmul.mubr.f32.vlgmr.msra.gmra.mrb[0].mxu0 %v210_v30  ;;  %v211_v31 = vsub.f32 %v209_v28, %v210_v30 }
  0x98   : > { %781 = vmatpush3.bf16.msra.mxu0 %v780_v15  ;;  %755 = vmatprep.mubr.msk.f32.mxu0 %vm905_vm0, %v904_v10 }
  0x99   : > { %v212_v33 = vand.u32 4294901760, %v211_v31  ;;  %753 = vmatprep.subr.mxu0 %v904_v10 }
  0x9b   : > { %720 = vmatmul.mubr.f32.vlgmr.msra.gmra.mrb[0].mxu1 %v212_v33 }
  0x9c   : > { %772 = vmatpush3.bf16.msra.mxu1 %v771_v20  ;;  %754 = vmatpush3.msra.mxu0 %v235_v29 }
  0x9d   : > { %726 = vmatprep.subr.mxu1 %v904_v10  ;;  %782 = vmatprep.subr.bf16.mxu0 %v903_v7 }
  0x9e   : > { %728 = vmatprep.mubr.msk.f32.mxu1 %vm905_vm0, %v904_v10 }
  0x9f   : > { %756 = vmatmul.mubr.msk.f32.vlgmr.msra.gmra.mrb[0].mxu0 %vm136_vm1, %v681_v26 }
  0xa0   : > { %727 = vmatpush3.msra.mxu1 %v237_v34  ;;  %784 = vmatpush3.bf16.msra.mxu0 %v768_v6 }
  0xa1   : > { %773 = vmatprep.subr.bf16.mxu1 %v903_v7  ;;  %762 = vmatprep.subr.mxu0 %v904_v10 }
  0xa2   : > { %764 = vmatprep.mubr.msk.f32.mxu0 %vm905_vm0, %v904_v10 }
  0xa3   : > { %729 = vmatmul.mubr.msk.f32.vlgmr.msra.gmra.mrb[0].mxu1 %vm136_vm1, %v681_v26 }
  0xa4   : > { %775 = vmatpush3.bf16.msra.mxu1 %v774_v21  ;;  %763 = vmatpush3.msra.mxu0 %v147_v12 }
  0xa5   : > { %735 = vmatprep.subr.mxu1 %v904_v10  ;;  %737 = vmatprep.mubr.msk.f32.mxu1 %vm905_vm0, %v904_v10 }
  0xa7   : > { %765 = vmatmul.mubr.msk.f32.vlgmr.msra.gmra.mrb[0].mxu0 %vm136_vm1, %v681_v26 }
  0xa8   : > { %736 = vmatpush3.msra.mxu1 %v234_v25 }
  0xab   : > { %738 = vmatmul.mubr.f32.vlgmr.msra.gmra.mrb[0].mxu1 %v209_v28 }
 0x17a   : > { %v608_v35 = vpop.f32.mrb[0].mxu0 }
 0x17b   : > { %v766_v36 = vpop.f32.mrb[1].mxu0 }
 0x17e   : > { %v378_v37 = vpop.f32.mrb[0].mxu1 }
 0x17f   : > { %v785_v38 = vadd.f32 %v608_v35, %v378_v37  ;;  %v739_v39 = vpop.f32.mrb[1].mxu1 }
 0x181   : > { %612 = vst [vmem:[%s121_s6] sm:$0xff] %v785_v38 }
 0x182   : > { %851 = shalt.err (!%p848_p2)
}
 0x183   : > { %s852_s24 = scalar_lea.hbm %s998_s16, 128  ;;  %s856_s27 = scalar_lea.hbm %s1042_s2, 1024 }
 0x184   : > { %p853_p3 = scmp.ne.s32.totalorder %s998_s16, %s852_s24  ;;  %p857_p8 = scmp.lt.u32.totalorder %s998_s16, %s1042_s2 }
 0x185   : > { %p858_p9 = scmp.lt.u32.totalorder %s856_s27, %s852_s24  ;;  %p860_p11 = scmp.lt.u32.totalorder %s852_s24, %s998_s16 }
 0x186   : > { %p854_p4 = pnand %p853_p3, %p960_p5 }
 0x187   : > { %p859_p10 = por %p858_p9, %p857_p8 }
 0x188   : > { %p855_p7 = pneg %p854_p4 }
 0x189   : > { %p861_p12 = por %p860_p11, %p859_p10 }
 0x18b   : > { %p862_p13 = pnand %p861_p12, %p855_p7 }
 0x18d   : > { %865 = shalt.err (!%p862_p13)
}
 0x18e   : > { %794 = dma.vmem_to_hbm [thread:$0]  (%p960_p5), %s1000_s7, 128, %s998_s16, %s614_s17  }
 0x18f PF: > { %p800_p0 = scmp.ge.s32.totalorder %s900_s12, 2  ;;  %s639_s30 = sand.u32 1, %s888_s9  }
 0x190   : > { %s640_s3 = scalar_lea.sflag [#allocation3], %s639_s30 }
 0x191   : > { %p797_p1 = pnand %p800_p0, %p964_p6 }
 0x193   : > { %883 = dma.done.wait (!%p797_p1), %s640_s3, 128  }
 0x194   : > { %885 = vsyncadd (!%p797_p1), %s640_s3, 4294967168  ;;  %p12_p2 = scmp.ge.s32.totalorder %s947_s15, 10   ;;  %s1045_s9 = smov %s892_s10 }
 0x195   : > { %s1046_s10 = smov %s896_s11  ;;  %s1047_s11 = smov %s958_s18 }
 0x196   : > { %s1048_s12 = smov %s947_s15  ;;  %14 = sbr.rel (!%p12_p2) target bundleno = 3 (0x3), region = 61 }
 0x19d   :  { %645 = vsyncpa [#allocation3], 1 }
 0x19e   :  { %647 = vsyncpa [#allocation3 + $0x1], 1 }

</bundles_post_ra>
